<compile_context>
chip_gen: v5e
topology: v5e:2x2
jax: 0.10.0
libtpu: 0.0.40
codegen_flags: <defaults>
</compile_context>

<pallas_src>
import functools

import jax
import jax.numpy as jnp
from jax.experimental import pallas as pl
from jax.experimental.pallas import tpu as pltpu


_MASK_VALUE = -1e30  # finite "-inf" (exp underflows to exactly 0 in f32)


# ---------------------------------------------------------------------------
# Linear projection kernel (W_q / W_k / W_v / W_o).
# ---------------------------------------------------------------------------
def _linear_kernel(x_ref, w_ref, b_ref, o_ref):
    acc = jnp.dot(x_ref[...], w_ref[...], preferred_element_type=jnp.float32)
    o_ref[...] = (acc + b_ref[...].astype(jnp.float32)).astype(o_ref.dtype)


def linear(x, w, b=None, *, block_rows=512):
    """x: [M, K], w: [K, N], b: [N] or None. Returns x @ w (+ b)."""
    M, K = x.shape
    N = w.shape[1]
    bias = jnp.zeros((1, N), dtype=x.dtype) if b is None else b.reshape(1, N).astype(x.dtype)
    tm = M if M <= block_rows else block_rows
    return pl.pallas_call(
        _linear_kernel,
        out_shape=jax.ShapeDtypeStruct((M, N), x.dtype),
        grid_spec=pltpu.PrefetchScalarGridSpec(
            num_scalar_prefetch=0,
            grid=(pl.cdiv(M, tm),),
            in_specs=[
                pl.BlockSpec((tm, K), lambda i: (i, 0)),
                pl.BlockSpec((K, N), lambda i: (0, 0)),
                pl.BlockSpec((1, N), lambda i: (0, 0)),
            ],
            out_specs=pl.BlockSpec((tm, N), lambda i: (i, 0)),
        ),
        compiler_params=pltpu.CompilerParams(dimension_semantics=("parallel",)),
    )(x, w, bias)


# ---------------------------------------------------------------------------
# Scaled dot-product attention kernel.
# ---------------------------------------------------------------------------
def _attn_kernel(*refs, scale, has_mask):
    if has_mask:
        q_ref, k_ref, v_ref, m_ref, out_ref, probs_ref = refs
    else:
        q_ref, k_ref, v_ref, out_ref, probs_ref = refs

    # Fold 1/scale into q (TQ*D elements) instead of scaling the TQ*Lk scores;
    # keep q/k/v in their native dtype so bf16 inputs take the fast MXU path.
    q = q_ref[0] * (1.0 / scale)                                  # [HB, TQ, D]
    k = k_ref[0]                                                  # [HB, Lk, D]
    v = v_ref[0]                                                  # [HB, Lk, D]

    # Batched contraction over the shared D axis -- no explicit k.T transpose.
    scores = jnp.einsum("hqd,hkd->hqk", q, k,
                        preferred_element_type=jnp.float32)       # [HB, TQ, Lk] f32

    if has_mask:
        # mask block is [1 or HB, TQ, Lk] int8; broadcasts across heads if shared.
        scores = jnp.where(m_ref[0] == 0, _MASK_VALUE, scores)

    # Numerically stable softmax over Lk.
    row_max = jnp.max(scores, axis=-1, keepdims=True)
    e = jnp.exp(scores - row_max)
    denom = jnp.sum(e, axis=-1, keepdims=True)
    # EUP approximate reciprocal + one Newton step on the tiny [HB, TQ, 1] tensor:
    # keeps the VALU off the softmax critical path while restoring ~f32 accuracy.
    inv = pl.reciprocal(denom, approx=True)
    inv = inv * (2.0 - denom * inv)
    probs = e * inv                                               # [HB, TQ, Lk] f32

    # output = dropout(probs) @ v   (dropout = identity in eval mode).
    out = jnp.einsum("hqk,hkd->hqd", probs.astype(v.dtype), v,
                     preferred_element_type=jnp.float32)          # [HB, TQ, D]

    out_ref[0] = out.astype(out_ref.dtype)
    probs_ref[0] = probs.astype(probs_ref.dtype)


def _attention_block_bytes(hb, tq, lk, d, in_isz, out_isz, probs_isz, mask_heads):
    io = hb * tq * d * in_isz            # q block
    io += 2 * hb * lk * d * in_isz       # k, v blocks
    io += hb * tq * d * out_isz          # out block
    io += hb * tq * lk * probs_isz       # probs block
    io += mask_heads * tq * lk           # int8 mask block
    tmp = 2 * hb * tq * lk * 4           # f32 scores / exp temporaries
    return 2 * io + tmp                  # x2: double-buffered pipeline stages


def _pick_heads_per_block(H, tq, lk, d, in_isz, out_isz, probs_isz,
                          mask_shared, has_mask, budget=8 << 20):
    best = 1
    for hb in range(1, H + 1):
        if H % hb:
            continue
        mask_heads = 0 if not has_mask else (1 if mask_shared else hb)
        if _attention_block_bytes(hb, tq, lk, d, in_isz, out_isz, probs_isz,
                                  mask_heads) <= budget:
            best = hb
    return best


def scaled_dot_product_attention(query, key, value, mask=None, *, scale, dropout_rate=0.0):
    """query: [B, H, Lq, D]; key/value: [B, H, Lk, D];
    mask: None, [B, Lq, Lk], [B, 1, Lq, Lk] or [B, H, Lq, Lk] (0 => masked).
    Returns (output [B, H, Lq, D], attn_probs [B, H, Lq, Lk])."""
    del dropout_rate  # eval-mode dropout == identity
    B, H, Lq, D = query.shape
    Lk = key.shape[2]
    probs_dtype = query.dtype  # match torch: softmax keeps the input dtype

    has_mask = mask is not None
    mask_shared = True
    if has_mask:
        if mask.ndim == 3:
            mask = mask[:, None]                      # [B, 1, Lq, Lk]
        if mask.shape[1] == 1:
            mask_shared = True
        elif mask.shape[1] == H:
            mask_shared = False
        else:
            raise ValueError(f"mask head dim must be 1 or {H}, got {mask.shape}")
        mask = mask.astype(jnp.int8)                  # 4x less HBM traffic than int32

    tq = Lq if Lq <= 256 else 256
    n_q = pl.cdiv(Lq, tq)
    in_isz = query.dtype.itemsize
    out_isz = query.dtype.itemsize
    probs_isz = jnp.dtype(probs_dtype).itemsize
    hb = _pick_heads_per_block(H, tq, Lk, D, in_isz, out_isz, probs_isz,
                               mask_shared, has_mask)
    mask_heads = 0 if not has_mask else (1 if mask_shared else hb)
    vmem_est = _attention_block_bytes(hb, tq, Lk, D, in_isz, out_isz, probs_isz, mask_heads)
    vmem_limit = int(min(max(vmem_est + (4 << 20), 32 << 20), 64 << 20))

    in_specs = [
        pl.BlockSpec((1, hb, tq, D), lambda b, h, i: (b, h, i, 0)),
        pl.BlockSpec((1, hb, Lk, D), lambda b, h, i: (b, h, 0, 0)),
        pl.BlockSpec((1, hb, Lk, D), lambda b, h, i: (b, h, 0, 0)),
    ]
    inputs = [query, key, value]
    if has_mask:
        if mask_shared:
            in_specs.append(pl.BlockSpec((1, 1, tq, Lk), lambda b, h, i: (b, 0, i, 0)))
        else:
            in_specs.append(pl.BlockSpec((1, hb, tq, Lk), lambda b, h, i: (b, h, i, 0)))
        inputs.append(mask)

    out_specs = [
        pl.BlockSpec((1, hb, tq, D), lambda b, h, i: (b, h, i, 0)),
        pl.BlockSpec((1, hb, tq, Lk), lambda b, h, i: (b, h, i, 0)),
    ]
    out_shape = (
        jax.ShapeDtypeStruct((B, H, Lq, D), query.dtype),
        jax.ShapeDtypeStruct((B, H, Lq, Lk), probs_dtype),
    )

    kernel = functools.partial(_attn_kernel, scale=float(scale), has_mask=has_mask)
    out, probs = pl.pallas_call(
        kernel,
        out_shape=out_shape,
        grid_spec=pltpu.PrefetchScalarGridSpec(
            num_scalar_prefetch=0,
            grid=(B, H // hb, n_q),
            in_specs=in_specs,
            out_specs=out_specs,
        ),
        compiler_params=pltpu.CompilerParams(
            dimension_semantics=("parallel", "parallel", "parallel"),
            vmem_limit_bytes=vmem_limit,
        ),
    )(*inputs)
    return out, probs


# ---------------------------------------------------------------------------
# MultiHeadAttention forward.
# ---------------------------------------------------------------------------
def init_mha_params(key, d_model, dtype=jnp.float32):
    k1, k2, k3, k4, k5 = jax.random.split(key, 5)
    s = 1.0 / (d_model ** 0.5)
    return {
        "w_q": jax.random.normal(k1, (d_model, d_model), dtype) * s,
        "w_k": jax.random.normal(k2, (d_model, d_model), dtype) * s,
        "w_v": jax.random.normal(k3, (d_model, d_model), dtype) * s,
        "w_o": jax.random.normal(k4, (d_model, d_model), dtype) * s,
        "b_o": jax.random.normal(k5, (d_model,), dtype) * 0.1,
    }


def multi_head_attention(query, key, value, params, mask=None, *, n_heads, dropout_rate=0.1):
    """query/key/value: [B, L, d_model]; mask: [B, Lq, Lk] (0 => masked) or None.
    Returns (output [B, Lq, d_model], attn_probs [B, n_heads, Lq, Lk])."""
    B, Lq, d_model = query.shape
    Lk = key.shape[1]
    assert d_model % n_heads == 0
    d_k = d_model // n_heads

    q = linear(query.reshape(B * Lq, d_model), params["w_q"])
    k = linear(key.reshape(B * Lk, d_model), params["w_k"])
    v = linear(value.reshape(B * Lk, d_model), params["w_v"])

    # split_heads: [B, L, d_model] -> [B, H, L, d_k]  (layout plumbing, wrapper-side)
    qh = q.reshape(B, Lq, n_heads, d_k).transpose(0, 2, 1, 3)
    kh = k.reshape(B, Lk, n_heads, d_k).transpose(0, 2, 1, 3)
    vh = v.reshape(B, Lk, n_heads, d_k).transpose(0, 2, 1, 3)

    ctx, attn = scaled_dot_product_attention(
        qh, kh, vh, mask, scale=float(d_k) ** 0.5, dropout_rate=dropout_rate)

    # group_heads: [B, H, Lq, d_k] -> [B, Lq, d_model]
    ctx = ctx.transpose(0, 2, 1, 3).reshape(B * Lq, d_model)
    out = linear(ctx, params["w_o"], params["b_o"]).reshape(B, Lq, d_model)
    return out, attn


# ---------------------------------------------------------------------------
# Pure-JAX reference (same math as the PyTorch forward, eval mode).
# ---------------------------------------------------------------------------
def _reference_mha(query, key, value, params, mask, n_heads):
    B, Lq, d_model = query.shape
    Lk = key.shape[1]
    d_k = d_model // n_heads
    q = (query.reshape(-1, d_model) @ params["w_q"]).reshape(B, Lq, n_heads, d_k).transpose(0, 2, 1, 3)
    k = (key.reshape(-1, d_model) @ params["w_k"]).reshape(B, Lk, n_heads, d_k).transpose(0, 2, 1, 3)
    v = (value.reshape(-1, d_model) @ params["w_v"]).reshape(B, Lk, n_heads, d_k).transpose(0, 2, 1, 3)
    scale = float(d_k) ** 0.5
    # Scale folded into q: mathematically identical to scores/scale, and mirrors the
    # kernel so the default-precision MXU operands match.
    scores = jnp.einsum("bhqd,bhkd->bhqk", q * (1.0 / scale), k)
    if mask is not None:
        scores = jnp.where(mask[:, None, :, :] == 0, -jnp.inf, scores)
    probs = jax.nn.softmax(scores, axis=-1)
    ctx = jnp.einsum("bhqk,bhkd->bhqd", probs, v)
    ctx = ctx.transpose(0, 2, 1, 3).reshape(B * Lq, d_model)
    out = (ctx @ params["w_o"] + params["b_o"]).reshape(B, Lq, d_model)
    return out, probs


if __name__ == "__main__":
    # Small deterministic example: batch=2, seq=8, d_model=64, heads=4 (d_k=16).
    B, L, d_model, n_heads = 2, 8, 64, 4

    root = jax.random.PRNGKey(0)
    k_q, k_k, k_v, k_m, k_p = jax.random.split(root, 5)
    query = jax.random.normal(k_q, (B, L, d_model), dtype=jnp.float32)
    key_in = jax.random.normal(k_k, (B, L, d_model), dtype=jnp.float32)
    value_in = jax.random.normal(k_v, (B, L, d_model), dtype=jnp.float32)
    params = init_mha_params(k_p, d_model)

    # Padding-style mask (1 = keep, 0 = masked); keep column 0 so no row is fully masked.
    mask = (jax.random.uniform(k_m, (B, L, L)) > 0.2).astype(jnp.int32)
    mask = mask.at[..., 0].set(1)

    out, attn = multi_head_attention(query, key_in, value_in, params, mask,
                                     n_heads=n_heads, dropout_rate=0.0)
    jax.block_until_ready((out, attn))

    out_ref, attn_ref = _reference_mha(query, key_in, value_in, params, mask, n_heads)

    # Tolerance accounts for TPU default (bf16-operand) matmul precision and the
    # EUP exp/reciprocal path inside the kernel.
    assert out.shape == (B, L, d_model) and attn.shape == (B, n_heads, L, L)
    assert jnp.allclose(out, out_ref, atol=1e-3, rtol=1e-3), \
        float(jnp.max(jnp.abs(out - out_ref)))
    assert jnp.allclose(attn, attn_ref, atol=1e-3, rtol=1e-3), \
        float(jnp.max(jnp.abs(attn - attn_ref)))

    print("KERNEL_OK")
</pallas_src>

<mosaic_0001>
module attributes {stable_mosaic.version = 11 : i64} {
  func.func @_linear_kernel(%arg0: i32, %arg1: memref<16x64xf32, #tpu.memory_space<vmem>>, %arg2: memref<64x64xf32, #tpu.memory_space<vmem>>, %arg3: memref<1x64xf32, #tpu.memory_space<vmem>>, %arg4: memref<16x64xf32, #tpu.memory_space<vmem>>) attributes {dimension_semantics = [#tpu.dimension_semantics<parallel>], iteration_bounds = array<i64: 1>, scalar_prefetch = 0 : i64, scratch_operands = 0 : i64, tpu.core_type = #tpu.core_type<tc>, window_params = [{transform_indices = @transform_0, window_bounds = array<i64: 16, 64>}, {pipeline_mode = #tpu.pipeline_mode<synchronous>, transform_indices = @transform_1, window_bounds = array<i64: 64, 64>}, {pipeline_mode = #tpu.pipeline_mode<synchronous>, transform_indices = @transform_2, window_bounds = array<i64: 1, 64>}, {transform_indices = @transform_3, window_bounds = array<i64: 16, 64>}]} {
    %c0 = arith.constant 0 : index
    %c0_0 = arith.constant 0 : index
    %0 = vector.load %arg1[%c0, %c0_0] : memref<16x64xf32, #tpu.memory_space<vmem>>, vector<16x64xf32>
    %c0_1 = arith.constant 0 : index
    %c0_2 = arith.constant 0 : index
    %1 = vector.load %arg2[%c0_1, %c0_2] : memref<64x64xf32, #tpu.memory_space<vmem>>, vector<64x64xf32>
    %cst = arith.constant dense<0.000000e+00> : vector<16x64xf32>
    %2 = tpu.matmul %0, %1, %cst {dimension_numbers = #tpu.dot_dimension_numbers<[1], [0], [0], [1], [0, 0, 1, 1], [], []>} : vector<16x64xf32>, vector<64x64xf32>, vector<16x64xf32> -> vector<16x64xf32>
    %c0_3 = arith.constant 0 : index
    %c0_4 = arith.constant 0 : index
    %3 = vector.load %arg3[%c0_3, %c0_4] : memref<1x64xf32, #tpu.memory_space<vmem>>, vector<1x64xf32>
    %4 = vector.broadcast %3 : vector<1x64xf32> to vector<16x64xf32>
    %5 = arith.addf %2, %4 : vector<16x64xf32>
    %c0_5 = arith.constant 0 : index
    %c0_6 = arith.constant 0 : index
    %6 = vector.load %arg4[%c0_5, %c0_6] : memref<16x64xf32, #tpu.memory_space<vmem>>, vector<16x64xf32>
    tpu.vector_store %arg4[%c0_5, %c0_6], %5 {strides = array<i32>} : memref<16x64xf32, #tpu.memory_space<vmem>>, vector<16x64xf32>,
    return
  }
  func.func @transform_0(%arg0: i32) -> (i32, i32) {
    %c0_i32 = arith.constant 0 : i32
    %c0_i32_0 = arith.constant 0 : i32
    return %arg0, %c0_i32 : i32, i32
  }
  func.func @transform_1(%arg0: i32) -> (i32, i32) {
    %c0_i32 = arith.constant 0 : i32
    %c0_i32_0 = arith.constant 0 : i32
    %c0_i32_1 = arith.constant 0 : i32
    return %c0_i32, %c0_i32_0 : i32, i32
  }
  func.func @transform_2(%arg0: i32) -> (i32, i32) {
    %c0_i32 = arith.constant 0 : i32
    %c0_i32_0 = arith.constant 0 : i32
    %c0_i32_1 = arith.constant 0 : i32
    return %c0_i32, %c0_i32_0 : i32, i32
  }
  func.func @transform_3(%arg0: i32) -> (i32, i32) {
    %c0_i32 = arith.constant 0 : i32
    %c0_i32_0 = arith.constant 0 : i32
    return %arg0, %c0_i32 : i32, i32
  }
}

</mosaic_0001>

<bundles_post_ra>
// kernel: tpu_custom_call.1
= control target key start
LH: loop header
LB: loop body
LE: loop exit
PB: predicated region body
PF: predicated region fallthrough
CT: control target
= control target key end

     0   :  { %8 = vsyncpa [#allocation3], 0  ;;  %s257_s0 = inlined_call_operand.hbm [shape: f32[16,64], index: 0, kind: input, shape index: {}]   ;;  %s258_s1 = inlined_call_operand.hbm [shape: f32[64,64], index: 1, kind: input, shape index: {}]   ;;  %s259_s2 = inlined_call_operand.vmem [shape: f32[1,64], index: 2, kind: input, shape index: {}]   ;;  %s260_s3 = inlined_call_operand.hbm [shape: f32[16,64], index: 3, kind: output, shape index: {}]  }
   0x1   :  { %9 = vsyncpa [#allocation6], 0 }
   0x2   :  { %10 = vsyncpa [#allocation4], 0  ;;  %s15_s14 = sshll.u32 %s257_s0, 4  ;;  %s207_s15 = smov [#allocation2]   ;;  %s16_s14 = int_to_ptr.hbm [resolvable:$true] %s15_s14 }
   0x3   :  { %s17_s16 = sshll.u32 %s207_s15, 4  ;;  %s28_s19 = sshll.u32 %s258_s1, 4  ;;  %s18_s16 = int_to_ptr.vmem [resolvable:$true] %s17_s16  ;;  %s29_s19 = int_to_ptr.hbm [resolvable:$true] %s28_s19 }
   0x4   :  { %s208_s20 = smov 128   ;;  %s209_s21 = smov 8  }
   0x5   :  { %23 = dma.hbm_to_vmem [thread:$0]  %s16_s14, 256, %s18_s16, [#allocation3], %s208_s20, %s208_s20, %s209_s21  }
   0x6   :  { %s210_s22 = smov [#allocation5]  }
   0x7   :  { %s30_s23 = sshll.u32 %s210_s22, 4  ;;  %s31_s23 = int_to_ptr.vmem [resolvable:$true] %s30_s23 }
   0x8   :  { %36 = dma.hbm_to_vmem [thread:$0]  %s29_s19, 1024, %s31_s23, [#allocation6], %s208_s20, %s208_s20, %s209_s21  }
   0x9   :  { %201 = dma.done.wait [#allocation3], 256  }
   0xa   :  { %202 = vsyncadd [#allocation3], 4294967040 }
   0xb   :  { %203 = dma.done.wait [#allocation6], 1024  }
   0xc   :  { %204 = vsyncadd [#allocation6], 4294966272  ;;  %v56_v0 = vld [vmem:[#allocation5 + $0x38] sm:$0xff]  ;;  %v55_v1 = vld [vmem:[#allocation5 + $0x30] sm:$0xff]  ;;  %vm61_vm0 = vcmask 523264   ;;  %s211_s24 = smov [#allocation7]  }
   0xd   :  { %76 = vmatpush.msra.mxu0 %v56_v0  ;;  %115 = vmatpush.msra.mxu1 %v56_v0  ;;  %v54_v2 = vld [vmem:[#allocation5 + $0x28] sm:$0xff]  ;;  %v53_v3 = vld [vmem:[#allocation5 + $0x20] sm:$0xff]  ;;  %v52_v4 = vld [vmem:[#allocation5 + $0x18] sm:$0xff]  ;;  %s97_s25 = sshll.u32 %s211_s24, 4  ;;  %s99_s28 = sshll.u32 %s260_s3, 4  ;;  %s98_s25 = int_to_ptr.vmem [resolvable:$true] %s97_s25  ;;  %s100_s28 = int_to_ptr.hbm [resolvable:$true] %s99_s28 }
   0xe   :  { %v51_v5 = vld [vmem:[#allocation5 + $0x10] sm:$0xff]  ;;  %v50_v6 = vld [vmem:[#allocation5 + $0x8] sm:$0xff]  ;;  %v49_v7 = vld [vmem:[#allocation5] sm:$0xff] }
   0xf   :  { %77 = vmatpush.msra.mxu0 %v55_v1  ;;  %116 = vmatpush.msra.mxu1 %v55_v1  ;;  %v47_v8 = vld [vmem:[#allocation2] sm:$0xff]  ;;  %v48_v9 = vld [vmem:[#allocation2 + $0x8] sm:$0xff] }
  0x10   :  { %v128_v10 = vld [vmem:[%s259_s2] ss:$0 sm:$0xff] }
  0x11   :  { %78 = vmatpush.msra.mxu0 %v54_v2  ;;  %117 = vmatpush.msra.mxu1 %v54_v2 }
  0x13   :  { %79 = vmatpush.msra.mxu0 %v53_v3  ;;  %118 = vmatpush.msra.mxu1 %v53_v3 }
  0x15   :  { %80 = vmatpush.msra.mxu0 %v52_v4  ;;  %119 = vmatpush.msra.mxu1 %v52_v4 }
  0x17   :  { %81 = vmatpush.msra.mxu0 %v51_v5  ;;  %120 = vmatpush.msra.mxu1 %v51_v5 }
  0x19   :  { %82 = vmatpush.msra.mxu0 %v50_v6  ;;  %121 = vmatpush.msra.mxu1 %v50_v6 }
  0x1b   :  { %83 = vmatpush.msra.mxu0 %v49_v7  ;;  %122 = vmatpush.msra.mxu1 %v49_v7 }
  0x1c   :  { %113 = vmatmul.msk.f32.vlgmr.msra.gmra.mxu0 %vm61_vm0, %v47_v8  ;;  %114 = vmatmul.msk.f32.vlgmr.msra.gmra.mxu1 %vm61_vm0, %v48_v9 }
  0x99   :  { %v85_v11 = vpop.f32.mrf.mxu0  ;;  %v88_v12 = vpop.f32.mrf.mxu1 }
  0x9a   :  { %v86_v13 = vadd.f32 %v128_v10, %v85_v11  ;;  %v89_v14 = vadd.f32 %v128_v10, %v88_v12 }
  0x9c   :  { %91 = vst.msk [vmem:[#allocation7] sm:$0xff] %vm61_vm0, %v86_v13 }
  0x9d   :  { %92 = vst.msk [vmem:[#allocation7 + $0x8] sm:$0xff] %vm61_vm0, %v89_v14 }
  0x9e   :  { %105 = dma.vmem_to_hbm [thread:$0]  %s98_s25, 256, %s100_s28, [#allocation4], %s208_s20, %s208_s20, %s209_s21  }
  0x9f   :  { %205 = dma.done.wait [#allocation4], 256  }
  0xa0   :  { %206 = vsyncadd [#allocation4], 4294967040 }
  0xa1   :  { %110 = vsyncpa [#allocation3], 1 }
  0xa2   :  { %111 = vsyncpa [#allocation6], 1 }
  0xa3   :  { %112 = vsyncpa [#allocation4], 1 }

</bundles_post_ra>
